<compile_context>
chip_gen: v7x
topology: tpu7x:2x2x1
jax: 0.10.0
libtpu: 0.0.40
codegen_flags: <defaults>
</compile_context>

<pallas_src>
import functools

import jax
import jax.numpy as jnp
from jax.experimental import pallas as pl
from jax.experimental.pallas import tpu as pltpu


def _gcn_block_kernel(w_ref, x_ref, wc_ref, b_ref, o_ref, *, n_real):
    # w_ref : (TB, 1, Np)  attention logits (kept 3-D so block dims == full dims)
    # x_ref : (TB, C, Np)  node features (channels on sublanes, nodes on lanes)
    # wc_ref: (C, C)       folded conv(1x1)+BN weight, (C_out, C_in), f32
    # b_ref : (C, 1)       folded conv bias + BN shift, f32
    # o_ref : (TB, C, Np)
    TB, C, Np = x_ref.shape

    # relu(tanh(w)); per-batch scalar s = sum_n wt^2 (the rank-1 adjacency).
    # Reductions stay in f32 even if the input dtype is bf16.
    wt = jnp.maximum(jnp.tanh(w_ref[...].astype(jnp.float32)), 0.0)  # (TB, 1, Np)
    wt = jnp.squeeze(wt, axis=1)                                     # (TB, Np)
    s = jnp.sum(wt * wt, axis=-1, keepdims=True)                     # (TB, 1)
    inv = 1.0 / (float(n_real) * s + 1.0)                            # 1 / rowsum(A+I)

    xf = x_ref[...].astype(jnp.float32)                              # in-vreg upcast
    colsum = jnp.sum(xf, axis=-1, keepdims=True)                     # (TB, C, 1)
    agg = (xf + s[:, :, None] * colsum) * inv[:, :, None]            # == L @ x

    # Channel mix: y[b,o,n] = sum_i wc[o,i] * agg[b,i,n] as a SINGLE contraction
    # over the whole block -> one big lane-dense (C, C) @ (C, TB*Np) MXU matmul.
    agg2 = jnp.transpose(agg, (1, 0, 2)).reshape(C, TB * Np)         # (C_in, TB*Np)
    y = jnp.dot(wc_ref[...], agg2, preferred_element_type=jnp.float32)
    y = jnp.maximum(y + b_ref[...], 0.0)                             # bias + ReLU
    o_ref[...] = jnp.transpose(y.reshape(C, TB, Np), (1, 0, 2)).astype(o_ref.dtype)


def gcn_block_forward(x, w, conv_w, conv_b, bn_gamma, bn_beta, bn_mean, bn_var,
                      eps=1e-5):
    B, C, N, _ = x.shape

    # Fold Conv2d(1x1) + eval-mode BatchNorm2d into a single affine (tiny, f32).
    s_bn = bn_gamma / jnp.sqrt(bn_var + eps)
    wc_eff = (conv_w.reshape(C, C) * s_bn[:, None]).astype(jnp.float32)
    b_eff = (conv_b * s_bn + (bn_beta - bn_mean * s_bn)).reshape(C, 1).astype(jnp.float32)

    # Free reshapes only; NO dtype cast of the big tensors in the wrapper.
    x_bcn = x.reshape(B, C, N)
    w3 = w.reshape(B, 1, N)

    # Lane-dense padding: pad N up to a multiple of 128 so the output stores are
    # unmasked and the channel-mix operand tiles cleanly. Exactness: padded w
    # logits are 0 -> contribute 0 to s; padded x columns are 0 -> contribute 0
    # to colsum; normalization uses the real N (n_real closure below).
    Np = ((N + 127) // 128) * 128
    if Np != N:
        x_bcn = jnp.pad(x_bcn, ((0, 0), (0, 0), (0, Np - N)))
        w3 = jnp.pad(w3, ((0, 0), (0, 0), (0, Np - N)))

    # Per-generation block-budget / step-count policy.
    kind = ""
    try:
        kind = jax.devices()[0].device_kind.lower()
    except Exception:
        pass
    if "v7" in kind or "7x" in kind:
        # 2 TCs, only 64 MiB physical VMEM: modest blocks, >=4 steps (2 per core).
        block_budget, min_steps, vmem_cap = 20 << 20, 4, 48 << 20
    elif "v6" in kind:
        # 1 TC, 128 MiB VMEM: big blocks, just keep >=2 steps for pipelining.
        block_budget, min_steps, vmem_cap = 32 << 20, 2, 112 << 20
    else:
        # v5e / unknown: 1 TC, conservative budget.
        block_budget, min_steps, vmem_cap = 14 << 20, 2, 112 << 20

    xb = jnp.dtype(x.dtype).itemsize
    wb = jnp.dtype(w.dtype).itemsize
    # Per-batch VMEM: double-buffered x-in + out + w blocks, plus in-kernel f32
    # temporaries (upcast x, agg, matmul operand/result) -> ~4 extra f32 copies.
    per_batch = 2 * (C * Np * (xb + xb) + 8 * Np * wb) + 4 * C * Np * 4
    tb = max(1, int(block_budget // per_batch))
    if B >= min_steps:
        tb = min(tb, B // min_steps)          # keep the grid long enough to pipeline
    tb = max(1, min(tb, B))
    grid = (pl.cdiv(B, tb),)                  # ragged last block allowed

    weight_bytes = (C * C + C) * 4
    vmem_limit = int(min(vmem_cap, max(32 << 20, tb * per_batch + weight_bytes + (8 << 20))))

    kernel = functools.partial(_gcn_block_kernel, n_real=N)
    out = pl.pallas_call(
        kernel,
        out_shape=jax.ShapeDtypeStruct((B, C, Np), x.dtype),
        grid_spec=pltpu.PrefetchScalarGridSpec(
            num_scalar_prefetch=0,
            grid=grid,
            in_specs=[
                pl.BlockSpec((tb, 1, Np), lambda b: (b, 0, 0)),   # w logits
                pl.BlockSpec((tb, C, Np), lambda b: (b, 0, 0)),   # x features
                pl.BlockSpec((C, C), lambda b: (0, 0)),           # folded weight
                pl.BlockSpec((C, 1), lambda b: (0, 0)),           # folded bias
            ],
            out_specs=pl.BlockSpec((tb, C, Np), lambda b: (b, 0, 0)),
        ),
        compiler_params=pltpu.CompilerParams(
            dimension_semantics=("parallel",),
            vmem_limit_bytes=vmem_limit,
        ),
    )(w3, x_bcn, wc_eff, b_eff)

    if Np != N:
        out = out[:, :, :N]
    # (B, C, N) -> (B, C, N, 1): free reshape, matches the PyTorch output layout.
    return out[..., None]


def _reference(x, w, conv_w, conv_b, g, beta, m, v, eps=1e-5):
    # Pure-JAX replica of the PyTorch forward (explicit NxN path, eval-mode BN).
    wt = jnp.maximum(jnp.tanh(w), 0.0)[..., None]            # (B, N, 1)
    A = jnp.matmul(jnp.swapaxes(wt, 1, 2), wt)               # (B, 1, 1)
    N = x.shape[2]
    A = A + jnp.eye(N, dtype=x.dtype)[None]                  # (B, N, N)
    D = jax.vmap(jnp.diag)((1.0 / jnp.sum(A, -1)) ** 0.5)
    L = jnp.matmul(jnp.matmul(D, A), D)
    xt = jnp.swapaxes(x[..., 0], 1, 2)                       # (B, N, C)
    agg = jnp.matmul(L, xt)                                  # (B, N, C)
    y = jnp.einsum("bnc,oc->bno", agg, conv_w.reshape(conv_w.shape[0], -1)) + conv_b
    y = (y - m) / jnp.sqrt(v + eps) * g + beta
    y = jnp.maximum(y, 0.0)
    return jnp.swapaxes(y, 1, 2)[..., None]


if __name__ == "__main__":
    B, C, N = 2, 4, 16
    key = jax.random.PRNGKey(0)
    k1, k2, k3, k4, k5, k6, k7, k8 = jax.random.split(key, 8)

    x = jax.random.normal(k1, (B, C, N, 1), jnp.float32)
    w = jax.random.normal(k2, (B, N), jnp.float32)

    # Deterministic synthetic parameters (Conv2d(C,C,1x1) + BatchNorm2d(C)).
    conv_w = 0.1 * jax.random.normal(k3, (C, C, 1, 1), jnp.float32)
    conv_b = 0.1 * jax.random.normal(k4, (C,), jnp.float32)
    bn_gamma = 1.0 + 0.1 * jax.random.normal(k5, (C,), jnp.float32)
    bn_beta = 0.1 * jax.random.normal(k6, (C,), jnp.float32)
    bn_mean = 0.1 * jax.random.normal(k7, (C,), jnp.float32)
    bn_var = 1.0 + 0.1 * jnp.abs(jax.random.normal(k8, (C,), jnp.float32))

    out = gcn_block_forward(x, w, conv_w, conv_b, bn_gamma, bn_beta, bn_mean, bn_var)
    out = jax.block_until_ready(out)

    ref = _reference(x, w, conv_w, conv_b, bn_gamma, bn_beta, bn_mean, bn_var)
    assert out.shape == (B, C, N, 1), out.shape
    assert jnp.allclose(out, ref, atol=1e-4, rtol=1e-4), "mismatch vs pure-JAX reference"

    print("KERNEL_OK")
</pallas_src>

<mosaic_0001>
module attributes {stable_mosaic.version = 11 : i64} {
  func.func @_gcn_block_kernel(%arg0: i32, %arg1: memref<1x1x128xf32, #tpu.memory_space<vmem>>, %arg2: memref<1x4x128xf32, #tpu.memory_space<vmem>>, %arg3: memref<4x4xf32, #tpu.memory_space<vmem>>, %arg4: memref<4x1xf32, #tpu.memory_space<vmem>>, %arg5: memref<1x4x128xf32, #tpu.memory_space<vmem>>) attributes {dimension_semantics = [#tpu.dimension_semantics<parallel>], iteration_bounds = array<i64: 2>, scalar_prefetch = 0 : i64, scratch_operands = 0 : i64, tpu.core_type = #tpu.core_type<tc>, window_params = [{transform_indices = @transform_0, window_bounds = array<i64: 1, 1, 128>}, {transform_indices = @transform_1, window_bounds = array<i64: 1, 4, 128>}, {pipeline_mode = #tpu.pipeline_mode<synchronous>, transform_indices = @transform_2, window_bounds = array<i64: 4, 4>}, {pipeline_mode = #tpu.pipeline_mode<synchronous>, transform_indices = @transform_3, window_bounds = array<i64: 4, 1>}, {transform_indices = @transform_4, window_bounds = array<i64: 1, 4, 128>}]} {
    %c0 = arith.constant 0 : index
    %c0_0 = arith.constant 0 : index
    %c0_1 = arith.constant 0 : index
    %0 = vector.load %arg1[%c0, %c0_0, %c0_1] : memref<1x1x128xf32, #tpu.memory_space<vmem>>, vector<1x1x128xf32>
    %1 = math.tanh %0 : vector<1x1x128xf32>
    %cst = arith.constant 0.000000e+00 : f32
    %2 = vector.broadcast %cst : f32 to vector<1x1x128xf32>
    %3 = arith.maximumf %1, %2 : vector<1x1x128xf32>
    %4 = vector.shape_cast %3 : vector<1x1x128xf32> to vector<1x128xf32>
    %5 = arith.mulf %4, %4 : vector<1x128xf32>
    %cst_2 = arith.constant dense<0.000000e+00> : vector<1xf32>
    %6 = vector.multi_reduction <add>, %5, %cst_2 [1] : vector<1x128xf32> to vector<1xf32>
    %7 = vector.shape_cast %6 : vector<1xf32> to vector<1x1xf32>
    %cst_3 = arith.constant 1.600000e+01 : f32
    %8 = vector.broadcast %cst_3 : f32 to vector<1x1xf32>
    %9 = arith.mulf %8, %7 : vector<1x1xf32>
    %cst_4 = arith.constant 1.000000e+00 : f32
    %10 = vector.broadcast %cst_4 : f32 to vector<1x1xf32>
    %11 = arith.addf %9, %10 : vector<1x1xf32>
    %cst_5 = arith.constant 1.000000e+00 : f32
    %12 = vector.broadcast %cst_5 : f32 to vector<1x1xf32>
    %13 = arith.divf %12, %11 : vector<1x1xf32>
    %c0_6 = arith.constant 0 : index
    %c0_7 = arith.constant 0 : index
    %c0_8 = arith.constant 0 : index
    %14 = vector.load %arg2[%c0_6, %c0_7, %c0_8] : memref<1x4x128xf32, #tpu.memory_space<vmem>>, vector<1x4x128xf32>
    %cst_9 = arith.constant dense<0.000000e+00> : vector<1x4xf32>
    %15 = vector.multi_reduction <add>, %14, %cst_9 [2] : vector<1x4x128xf32> to vector<1x4xf32>
    %16 = vector.shape_cast %15 : vector<1x4xf32> to vector<1x4x1xf32>
    %17 = vector.shape_cast %7 : vector<1x1xf32> to vector<1x1x1xf32>
    %18 = vector.broadcast %17 : vector<1x1x1xf32> to vector<1x4x1xf32>
    %19 = arith.mulf %18, %16 : vector<1x4x1xf32>
    %20 = vector.broadcast %19 : vector<1x4x1xf32> to vector<1x4x128xf32>
    %21 = arith.addf %14, %20 : vector<1x4x128xf32>
    %22 = vector.shape_cast %13 : vector<1x1xf32> to vector<1x1x1xf32>
    %23 = vector.broadcast %22 : vector<1x1x1xf32> to vector<1x4x128xf32>
    %24 = arith.mulf %21, %23 : vector<1x4x128xf32>
    %25 = tpu.transpose %24, [1, 0, 2] : vector<1x4x128xf32> -> vector<4x1x128xf32>
    %26 = vector.shape_cast %25 : vector<4x1x128xf32> to vector<4x128xf32>
    %c0_10 = arith.constant 0 : index
    %c0_11 = arith.constant 0 : index
    %27 = vector.load %arg3[%c0_10, %c0_11] : memref<4x4xf32, #tpu.memory_space<vmem>>, vector<4x4xf32>
    %cst_12 = arith.constant dense<0.000000e+00> : vector<4x128xf32>
    %28 = tpu.matmul %27, %26, %cst_12 {dimension_numbers = #tpu.dot_dimension_numbers<[1], [0], [0], [1], [0, 0, 1, 1], [], []>} : vector<4x4xf32>, vector<4x128xf32>, vector<4x128xf32> -> vector<4x128xf32>
    %c0_13 = arith.constant 0 : index
    %c0_14 = arith.constant 0 : index
    %29 = vector.load %arg4[%c0_13, %c0_14] : memref<4x1xf32, #tpu.memory_space<vmem>>, vector<4x1xf32>
    %30 = vector.broadcast %29 : vector<4x1xf32> to vector<4x128xf32>
    %31 = arith.addf %28, %30 : vector<4x128xf32>
    %cst_15 = arith.constant 0.000000e+00 : f32
    %32 = vector.broadcast %cst_15 : f32 to vector<4x128xf32>
    %33 = arith.maximumf %31, %32 : vector<4x128xf32>
    %34 = vector.shape_cast %33 : vector<4x128xf32> to vector<4x1x128xf32>
    %35 = tpu.transpose %34, [1, 0, 2] : vector<4x1x128xf32> -> vector<1x4x128xf32>
    %c0_16 = arith.constant 0 : index
    %c0_17 = arith.constant 0 : index
    %c0_18 = arith.constant 0 : index
    %36 = vector.load %arg5[%c0_16, %c0_17, %c0_18] : memref<1x4x128xf32, #tpu.memory_space<vmem>>, vector<1x4x128xf32>
    tpu.vector_store %arg5[%c0_16, %c0_17, %c0_18], %35 {strides = array<i32>} : memref<1x4x128xf32, #tpu.memory_space<vmem>>, vector<1x4x128xf32>,
    return
  }
  func.func @transform_0(%arg0: i32) -> (i32, i32, i32) {
    %c0_i32 = arith.constant 0 : i32
    %c0_i32_0 = arith.constant 0 : i32
    %c0_i32_1 = arith.constant 0 : i32
    return %arg0, %c0_i32, %c0_i32_0 : i32, i32, i32
  }
  func.func @transform_1(%arg0: i32) -> (i32, i32, i32) {
    %c0_i32 = arith.constant 0 : i32
    %c0_i32_0 = arith.constant 0 : i32
    %c0_i32_1 = arith.constant 0 : i32
    return %arg0, %c0_i32, %c0_i32_0 : i32, i32, i32
  }
  func.func @transform_2(%arg0: i32) -> (i32, i32) {
    %c0_i32 = arith.constant 0 : i32
    %c0_i32_0 = arith.constant 0 : i32
    %c0_i32_1 = arith.constant 0 : i32
    return %c0_i32, %c0_i32_0 : i32, i32
  }
  func.func @transform_3(%arg0: i32) -> (i32, i32) {
    %c0_i32 = arith.constant 0 : i32
    %c0_i32_0 = arith.constant 0 : i32
    %c0_i32_1 = arith.constant 0 : i32
    return %c0_i32, %c0_i32_0 : i32, i32
  }
  func.func @transform_4(%arg0: i32) -> (i32, i32, i32) {
    %c0_i32 = arith.constant 0 : i32
    %c0_i32_0 = arith.constant 0 : i32
    %c0_i32_1 = arith.constant 0 : i32
    return %arg0, %c0_i32, %c0_i32_0 : i32, i32, i32
  }
}

</mosaic_0001>

<bundles_post_ra>
// kernel: tpu_custom_call.1
= control target key start
LH: loop header
LB: loop body
LE: loop exit
PB: predicated region body
PF: predicated region fallthrough
CT: control target
= control target key end

     0   :  { %9 = vsyncpa [#allocation3], 0  ;;  %s906_s0 = inlined_call_operand.hbm [shape: f32[2,1,128], index: 0, kind: input, shape index: {}]   ;;  %s907_s1 = inlined_call_operand.vmem [shape: f32[2,4,128], index: 1, kind: input, shape index: {}]   ;;  %s908_s2 = inlined_call_operand.vmem [shape: f32[4,4], index: 2, kind: input, shape index: {}]   ;;  %s909_s3 = inlined_call_operand.vmem [shape: f32[4,1], index: 3, kind: input, shape index: {}]   ;;  %s910_s4 = inlined_call_operand.hbm [shape: f32[2,4,128], index: 4, kind: output, shape index: {}]  }
   0x1   :  { %11 = vsyncpa [#allocation3 + $0x1], 0 }
   0x2   :  { %12 = vsyncpa [#allocation4], 0 }
   0x3   :  { %14 = vsyncpa [#allocation4 + $0x1], 0  ;;  %s731_s15 = smov 0   ;;  %s733_s16 = smov 0  }
   0x4   :  { %s735_s17 = smov 0   ;;  %s737_s18 = smov 0  }
   0x5 LB: > { %s752_s19 = sadd.s32 4294967295, %s696_s18   ;;  %s520_s20 = sadd.s32 4294967294, %s696_s18   ;;  %s696_s18 = sphi %s737_s18, %s925_s18   ;;  %s692_s17 = sphi %s735_s17, %s924_s17   ;;  %s688_s16 = sphi %s733_s16, %s923_s16   ;;  %s684_s15 = sphi %s731_s15, %s922_s15  }
   0x6   : > { %s756_s21 = sadd.s32 1, %s696_s18   ;;  %s27_s22 = sadd.s32 1, %s692_s17 }
   0x7   : > { %s24_s23 = ssub.s32 %s696_s18, %s756_s21  ;;  %p34_p0 = scmp.ne.s32.totalorder %s692_s17, %s688_s16 }
   0x8   : > { %p25_p1 = scmp.eq.s32.totalorder %s24_s23, 0  ;;  %p35_p2 = scmp.eq.s32.totalorder %s696_s18, 0 }
   0x9   : > { %p40_p3 = scmp.ne.s32.totalorder %s688_s16, %s684_s15  ;;  %p41_p4 = scmp.eq.s32.totalorder %s752_s19, 0 }
   0xa   : > { %s768_s24 = scalar_select %p25_p1, %s692_s17, %s27_s22  }
   0xb   : > { %p770_p5 = por %p35_p2, %p34_p0  ;;  %p774_p6 = por %p41_p4, %p40_p3 }
   0xc   : > { %p132_p7 = scmp.eq.s32.totalorder %s752_s19, 1  ;;  %p138_p8 = scmp.eq.s32.totalorder %s520_s20, 1 }
   0xd   : > { %p554_p10 = scmp.lt.s32.totalorder %s696_s18, 2  ;;  %s164_s29 = sand.u32 1, %s692_s17  }
   0xe   : > { %p781_p11 = por %p132_p7, %p34_p0  ;;  %p785_p12 = por %p138_p8, %p40_p3 }
   0xf   : > { %s523_s30 = sshll.u32 %s696_s18, 4  ;;  %s167_s8 = scalar_lea.vmem [#allocation2], %s164_s29 }
  0x10   : > { %s914_s27 = scalar_select %p781_p11, 1, 0 }
  0x11   : > { %s915_s28 = scalar_select %p785_p12, 1, 0 }
  0x12   : > { %s794_s7 = scalar_lea.hbm %s906_s0, %s523_s30  ;;  %s174_s9 = sshll.u32 %s167_s8, 4  ;;  %s796_s9 = int_to_ptr.vmem [resolvable:$true] %s174_s9 }
  0x13   : > { %p800_p13 = pnand %p554_p10, %p770_p5  ;;  %s165_s11 = scalar_lea.sflag [#allocation3], %s164_s29 }
  0x14   : > { %s600_s12 = scalar_lea.hbm %s794_s7, 16  ;;  %s605_s20 = scalar_lea.hbm %s906_s0, 32 }
  0x15   : > { %p601_p2 = scmp.ne.s32.totalorder %s794_s7, %s600_s12  ;;  %p602_p3 = pneg %p800_p13 }
  0x16   : > { %p606_p5 = scmp.lt.u32.totalorder %s794_s7, %s906_s0  ;;  %p607_p8 = scmp.lt.u32.totalorder %s605_s20, %s600_s12 }
  0x17   : > { %p603_p4 = pnand %p602_p3, %p601_p2  ;;  %p609_p9 = scmp.lt.u32.totalorder %s600_s12, %s794_s7 }
  0x18   : > { %p608_p10 = por %p607_p8, %p606_p5 }
  0x19   : > { %p604_p7 = pneg %p603_p4 }
  0x1a   : > { %p610_p0 = por %p609_p9, %p608_p10 }
  0x1c   : > { %p611_p1 = pnand %p610_p0, %p604_p7 }
  0x1e   : > { %614 = shalt.err (!%p611_p1)
}
  0x1f   : > { %s615_s25 = scalar_lea.vmem %s796_s9, 16  ;;  %s698_s29 = smov [#allocation2]  }
  0x20   : > { %p616_p2 = scmp.ne.s32.totalorder %s796_s9, %s615_s25  ;;  %s620_s30 = sshll.u32 %s698_s29, 4  ;;  %s621_s30 = int_to_ptr.vmem [resolvable:$false] %s620_s30 }
  0x21   : > { %s622_s5 = scalar_lea.vmem %s621_s30, 32  ;;  %p623_p11 = scmp.lt.s32.totalorder %s796_s9, %s621_s30 }
  0x22   : > { %p618_p4 = pnand %p616_p2, %p602_p3  ;;  %p624_p5 = scmp.lt.s32.totalorder %s622_s5, %s615_s25 }
  0x24   : > { %p619_p12 = pneg %p618_p4  ;;  %p625_p8 = por %p624_p5, %p623_p11 }
  0x26   : > { %p626_p9 = pnand %p625_p8, %p619_p12 }
  0x28   : > { %629 = shalt.err (!%p626_p9)
}
  0x29   : > { %549 = dma.hbm_to_vmem [thread:$0]  (!%p800_p13), %s794_s7, 16, %s796_s9, %s165_s11  }
  0x2a   : > { %p917_p0 = scmp.lt.s32.totalorder %s696_s18, 3  ;;  %p918_p1 = scmp.ge.s32.totalorder %s696_s18, 1 }
  0x2c   : > { %p187_p3 = pnand %p918_p1, %p917_p0 }
  0x2d   : > { %s836_s6 = sand.u32 (!%p187_p3), 1, %s688_s16  }
  0x2e   : > { %190 = sbr.rel (%p187_p3) target bundleno = 486 (0x1e6), region = 36  ;;  %s193_s8 = scalar_lea.sflag (!%p187_p3), [#allocation3], %s836_s6 }
  0x2f   : > { %s195_s12 = scalar_lea.vmem (!%p187_p3), [#allocation2], %s836_s6 }
  0x35   : > { %675 = dma.done.wait (%p774_p6), %s193_s8, 16  }
  0x36   : > { %677 = vsyncadd (%p774_p6), %s193_s8, 4294967280  ;;  %v227_v0 = vld [vmem:[%s195_s12] sm:$0x1]  ;;  %p223_p11 = scmp.lt.s32.totalorder %s752_s19, 1  ;;  %vm231_vm0 = vcmask 1040384   ;;  %vm240_vm1 = vcmask 1043456   ;;  %v244_v10 = vlaneseq }
  0x37   : > { %596 = vtanh.f32 %v227_v0  ;;  %v699_v7 = vmov 0.0   ;;  %vm700_vm2 = vmmov 0   ;;  %v280_v8 = vld [vmem:[%s909_s3] sm:$0xf]  ;;  %v701_v9 = vmov 0   ;;  %s525_s23 = sshll.u32 %s836_s6, 2 }
  0x38   : > { %s224_s7 = scalar_select %p223_p11, %s752_s19, 1  ;;  %537 = vmatprep.subr.mxu0 %v699_v7  ;;  %539 = vmatprep.mubr.msk.f32.mxu0 %vm700_vm2, %v699_v7  ;;  %v245_v13 = vshrl.u32 %v244_v10, 7  ;;  %v702_v16 = vmov 1983009808   ;;  %v703_v20 = vmov 1934713408  }
  0x39   : > { %594 = vset.pattern.permute.xlu1 %v701_v9  ;;  %595 = vset.pattern.permute.xlu0 %v701_v9  ;;  %v256_v17 = vunpack.c.l.s4 %v702_v16  ;;  %v264_v21 = vunpack.c.l.s4 %v703_v20  ;;  %vm291_vm3 = vcmask 1041409   ;;  %vm294_vm4 = vcmask 1042434   ;;  %v279_v42 = vld [vmem:[%s908_s2] sm:$0xf]  ;;  %s532_s25 = sshll.u32 %s752_s19, 6  ;;  %s222_s29 = scalar_lea.vmem [#allocation5], %s525_s23 }
  0x3a   : > { %s526_s9 = sshll.u32 %s224_s7, 2  ;;  %283 = vperm.xlu1 %594, %v280_v8   ;;  %v246_v15 = vsub.s32 0, %v245_v13  ;;  %vm297_vm5 = vcmask 1043459   ;;  %vm299_vm6 = vcmask 31744   ;;  %v704_v44 = vmov 1966171168   ;;  %s862_s12 = scalar_lea.hbm %s910_s4, %s532_s25 }
  0x3b   : > { %s226_s13 = scalar_lea.vmem %s907_s1, %s526_s9  ;;  %v257_v22 = vunpack.c.0.s8 %v256_v17  ;;  %v265_v24 = vunpack.c.0.s8 %v264_v21  ;;  %v378_v45 = vunpack.c.l.s4 %v704_v44  ;;  %s441_s30 = sshll.u32 %s222_s29, 4  ;;  %s864_s30 = int_to_ptr.vmem [resolvable:$true] %s441_s30 }
  0x3c   : > { %v239_v4 = vld [vmem:[%s226_s13] sm:$0xf]  ;;  %s428_s7 = scalar_lea.sflag [#allocation4], %s836_s6  ;;  %s630_s9 = scalar_lea.vmem %s864_s30, 64 }
  0x3d   : > { %v241_v6 = vsel %vm240_vm1, %v239_v4, 0.0  ;;  %v260_v27 = vsub.s32 %v257_v22, %v245_v13  ;;  %v268_v29 = vsub.s32 %v265_v24, %v245_v13  ;;  %v379_v46 = vunpack.c.0.s8 %v378_v45  ;;  %p631_p6 = scmp.ne.s32.totalorder %s864_s30, %s630_s9  ;;  %p919_p12 = scmp.ne.s32.totalorder %s914_s27, 0 }
  0x3e   : > { %s705_s19 = smov [#allocation5]  }
  0x3f   : > { %v382_v50 = vsub.s32 %v379_v46, %v245_v13  ;;  %p632_p13 = pnand %p631_p6, %p919_p12  ;;  %s634_s10 = sshll.u32 %s705_s19, 4  ;;  %s635_s10 = int_to_ptr.vmem [resolvable:$false] %s634_s10 }
  0x40   : > { %s636_s11 = scalar_lea.vmem %s635_s10, 128  ;;  %p637_p10 = scmp.lt.s32.totalorder %s864_s30, %s635_s10 }
  0x41   : > { %v597_v1 = vpop.eup %596  ;;  %p633_p7 = pneg %p632_p13  ;;  %p638_p2 = scmp.lt.s32.totalorder %s636_s11, %s630_s9 }
  0x42   : > { %v229_v2 = vmax.f32 %v597_v1, 0.0 }
  0x43   : > { %p639_p4 = por %p638_p2, %p637_p10 }
  0x44   : > { %v230_v3 = vmul.f32 %v229_v2, %v229_v2 }
  0x45   : > { %p640_p5 = pnand %p639_p4, %p633_p7 }
  0x46   : > { %v232_v5 = vsel %vm231_vm0, %v230_v3, 0.0 }
  0x47   : > { %233 = vadd.xlane.f32.xlu0 %v232_v5 }
  0x4b   : > { %242 = vadd.xlane.f32.xlu0 %v241_v6 }
  0xb9   : > { %v284_v47 = vpop.permute.xlu1 %283 }
  0xd4   : > { %v234_v11 = vpop.xlane.xlu0 %233 }
  0xd5   : > { %v235_v12 = vmul.f32 16.0, %v234_v11  ;;  %v247_v19 = vrot.slane %v234_v11, %v246_v15 }
  0xd7   : > { %v236_v14 = vadd.f32 1.0, %v235_v12 }
  0xd8   : > { %v243_v18 = vpop.xlane.xlu0 %242 }
  0xd9   : > { %598 = vrcp.f32 %v236_v14  ;;  %v248_v23 = vmul.f32 %v247_v19, %v243_v18 }
  0xdb   : > { %v249_v28 = vadd.f32 %v248_v23, %v239_v4 }
  0xe3   : > { %v599_v25 = vpop.eup %598 }
  0xe4   : > { %v253_v26 = vrot.slane %v599_v25, %v246_v15 }
  0xe6   : > { %v254_v30 = vmul.f32 %v253_v26, %v249_v28 }
  0xe8   : > { %v261_v31 = vrot.slane %v254_v30, %v260_v27 }
  0xea   : > { %v269_v32 = vrot.slane %v261_v31, %v268_v29  ;;  %v262_v33 = vcombine.high %v261_v31, %v699_v7 }
  0xec   : > { %v276_v34 = vrot.slane %v262_v33, %v268_v29  ;;  %v277_v35 = vcombine.high %v269_v32, %v699_v7 }
  0xee   : > { %v278_v36 = vcombine.high %v276_v34, %v699_v7  ;;  %v290_v37 = vrot.slane %v277_v35, 7  ;;  %v293_v38 = vrot.slane %v276_v34, 6 }
  0xf0   : > { %v292_v39 = vsel %vm291_vm3, %v290_v37, %v269_v32  ;;  %v296_v40 = vrot.slane %v278_v36, 5 }
  0xf1   : > { %v295_v41 = vsel %vm294_vm4, %v293_v38, %v292_v39 }
  0xf2   : > { %v298_v43 = vsel %vm297_vm5, %v296_v40, %v295_v41 }
  0xf3   : > { %538 = vmatpush3.msk.msra.mxu0 %vm240_vm1, %v298_v43 }
  0xf4   : > { %540 = vmatmul.mubr.msk.f32.vlgmr.msra.gmra.mrb[0].mxu0 %vm299_vm6, %v279_v42 }
 0x1c7   : > { %v371_v48 = vpop.f32.mrb[0].mxu0 }
 0x1c8   : > { %v372_v49 = vadd.f32 %v371_v48, %v284_v47  ;;  %v541_v51 = vpop.f32.mrb[1].mxu0 }
 0x1ca   : > { %v375_v52 = vmax.f32 %v372_v49, 0.0 }
 0x1cc   : > { %v383_v53 = vrot.slane %v375_v52, %v382_v50 }
 0x1ce   : > { %v384_v54 = vcombine.high %v383_v53, %v383_v53  ;;  %v391_v55 = vrot.slane %v383_v53, %v382_v50 }
 0x1d0   : > { %v398_v56 = vrot.slane %v384_v54, %v382_v50 }
 0x1d2   : > { %v401_v57 = vcombine.low %v391_v55, %v398_v56  ;;  %v529_v58 = vcombine.high %v391_v55, %v398_v56 }
 0x1d4   : > { %v409_v59 = vrot.slane %v401_v57, %v382_v50  ;;  %v416_v60 = vrot.slane %v529_v58, %v382_v50 }
 0x1d6   : > { %v417_v61 = vcombine.low %v409_v59, %v416_v60 }
 0x1d8   : > { %530 = vst.sshfl [vmem:[%s222_s29] sm:$0x55 pattern:$0x73625140] %v417_v61 }
 0x1d9   : > { %643 = shalt.err (!%p640_p5)
}
 0x1da   : > { %s644_s6 = scalar_lea.hbm %s862_s12, 64  ;;  %s648_s14 = scalar_lea.hbm %s910_s4, 128 }
 0x1db   : > { %p645_p8 = scmp.ne.s32.totalorder %s862_s12, %s644_s6  ;;  %p649_p1 = scmp.lt.u32.totalorder %s862_s12, %s910_s4 }
 0x1dc   : > { %p650_p3 = scmp.lt.u32.totalorder %s648_s14, %s644_s6  ;;  %p652_p6 = scmp.lt.u32.totalorder %s644_s6, %s862_s12 }
 0x1dd   : > { %p646_p9 = pnand %p645_p8, %p919_p12 }
 0x1de   : > { %p651_p11 = por %p650_p3, %p649_p1 }
 0x1df   : > { %p647_p0 = pneg %p646_p9 }
 0x1e0   : > { %p653_p13 = por %p652_p6, %p651_p11 }
 0x1e2   : > { %p654_p7 = pnand %p653_p13, %p647_p0 }
 0x1e4   : > { %657 = shalt.err (!%p654_p7)
}
 0x1e5   : > { %544 = dma.vmem_to_hbm [thread:$0]  (%p919_p12), %s864_s30, 64, %s862_s12, %s428_s7  }
 0x1e6 PF: > { %s453_s23 = sand.u32 1, %s684_s15   ;;  %p920_p10 = scmp.ne.s32.totalorder %s915_s28, 0 }
 0x1e7   : > { %p921_p2 = scmp.ge.s32.totalorder %s696_s18, 2  ;;  %s454_s25 = scalar_lea.sflag [#allocation4], %s453_s23 }
 0x1e9   : > { %p551_p4 = pnand %p921_p2, %p920_p10 }
 0x1eb   : > { %679 = dma.done.wait (!%p551_p4), %s454_s25, 64  }
 0x1ec   : > { %681 = vsyncadd (!%p551_p4), %s454_s25, 4294967232  ;;  %p17_p5 = scmp.ge.s32.totalorder %s756_s21, 4   ;;  %s922_s15 = smov %s688_s16 }
 0x1ed   : > { %s923_s16 = smov %s692_s17  ;;  %s924_s17 = smov %s768_s24 }
 0x1ee   : > { %s925_s18 = smov %s756_s21  ;;  %19 = sbr.rel (!%p17_p5) target bundleno = 5 (0x5), region = 84 }
 0x1f5   :  { %459 = vsyncpa [#allocation3], 1 }
 0x1f6   :  { %461 = vsyncpa [#allocation3 + $0x1], 1 }
 0x1f7   :  { %462 = vsyncpa [#allocation4], 1 }
 0x1f8   :  { %464 = vsyncpa [#allocation4 + $0x1], 1 }

</bundles_post_ra>
